<compile_context>
chip_gen: v7x
topology: tpu7x:2x2x1
jax: 0.10.0
libtpu: 0.0.40
codegen_flags: <defaults>
</compile_context>

<pallas_src>
import numpy as np
import jax
import jax.numpy as jnp
from jax.experimental import pallas as pl
from jax.experimental.pallas import tpu as pltpu

# ----------------------------- configuration (AlphaFold defaults) -----------------------------
FAPE_CFG = dict(weight=1.0, backbone_clamp_distance=10.0, backbone_loss_unit_distance=10.0,
                backbone_weight=0.5, sidechain_clamp_distance=10.0, sidechain_length_scale=10.0,
                sidechain_weight=0.5, eps=1e-4)
CHI_CFG = dict(weight=1.0, chi_weight=0.5, angle_norm_weight=0.01, eps=1e-6)
DIST_CFG = dict(weight=0.3, min_bin=2.3125, max_bin=21.6875, num_bins=64, eps=1e-8)
MSA_CFG = dict(weight=2.0, eps=1e-8)
PLDDT_CFG = dict(weight=0.01, cutoff=15.0, num_bins=50, min_resolution=0.1, max_resolution=3.0, eps=1e-10)
EXPRES_CFG = dict(weight=0.01, min_resolution=0.1, max_resolution=3.0, eps=1e-8)
MASKED_MEAN_EPS = 1e-4  # openfold masked_mean default

# chi_pi_periodic table (21 restypes x 4 chi angles): ASP chi2, GLU chi3, PHE chi2, TYR chi2.
CHI_PI_PERIODIC = jnp.array([
    [0, 0, 0, 0], [0, 0, 0, 0], [0, 0, 0, 0], [0, 1, 0, 0], [0, 0, 0, 0],
    [0, 0, 0, 0], [0, 0, 1, 0], [0, 0, 0, 0], [0, 0, 0, 0], [0, 0, 0, 0],
    [0, 0, 0, 0], [0, 0, 0, 0], [0, 0, 0, 0], [0, 1, 0, 0], [0, 0, 0, 0],
    [0, 0, 0, 0], [0, 0, 0, 0], [0, 0, 0, 0], [0, 1, 0, 0], [0, 0, 0, 0],
    [0, 0, 0, 0]], dtype=jnp.float32)

_PARAMS_1D = pltpu.CompilerParams(dimension_semantics=("parallel",))
_PARAMS_2D = pltpu.CompilerParams(dimension_semantics=("parallel", "parallel"))


def _pick_tile(n, row_bytes, budget_bytes, cap=128):
    """Largest divisor of n that is a multiple of 8, <= cap, and keeps the block under budget.
    TODO(synk): re-derive per generation (raise toward 128-192 on v5e/v6e's 128 MiB VMEM)."""
    target = int(min(cap, max(8, budget_bytes // max(int(row_bytes), 1))))
    if n <= target:
        return n
    best = n
    for t in range(8, min(target, n) + 1):
        if n % t == 0 and t % 8 == 0:
            best = t
    return best


# ------------------------------------ distogram loss ------------------------------------
def distogram_loss(logits, pseudo_beta, pseudo_beta_mask, *, min_bin, max_bin, num_bins, eps, **_):
    B, N, _, C = logits.shape
    # static squared bin boundaries (baked into the kernel as scalar constants; f32 like torch)
    bnd2 = [float(v) for v in
            (np.linspace(min_bin, max_bin, num_bins - 1, dtype=np.float32) ** 2).astype(np.float32)]

    # bf16-stream the (largest) logits tensor; all math stays f32 inside the kernel.
    lg16 = logits.astype(jnp.bfloat16)
    pb = pseudo_beta.astype(jnp.float32)                 # (B, N, 3)   row (sublane) side
    pbT = jnp.swapaxes(pb, -1, -2)                       # (B, 3, N)   lane-dense column side
    mask = pseudo_beta_mask.astype(jnp.float32)
    mrow = mask[..., None]                               # (B, N, 1)
    mcol = mask[:, None, :]                              # (B, 1, N)

    lane_pad_c = ((C + 127) // 128) * 128
    TILE = _pick_tile(N, N * lane_pad_c * 2, 4 << 20)    # bf16, lane-padded block budget ~4 MiB
    n_row = N // TILE

    def kernel(lg_ref, pbr_ref, pbT_ref, mr_ref, mc_ref, num_ref, den_ref):
        lg = lg_ref[0].astype(jnp.float32)               # (TILE, N, C)
        pr = pbr_ref[0]                                  # (TILE, 3)
        pc = pbT_ref[0]                                  # (3, N)
        mr = mr_ref[0]                                   # (TILE, 1)
        mc = mc_ref[0]                                   # (1, N)

        # squared pairwise distance, accumulated per coordinate (no (TILE,N,3) temporary)
        d2 = jnp.zeros((TILE, N), jnp.float32)
        for k in range(3):
            dk = pr[:, k:k + 1] - pc[k:k + 1, :]
            d2 = d2 + dk * dk

        # true bin = #(boundaries exceeded); unrolled scalar compares on lane-dense (TILE, N)
        binf = jnp.zeros((TILE, N), jnp.float32)
        for bval in bnd2:
            binf = binf + (d2 > bval).astype(jnp.float32)
        bin_idx = binf.astype(jnp.int32)

        # fused cross-entropy: errors = logsumexp(lg) - logit of the true bin
        mx = jnp.max(lg, axis=-1, keepdims=True)
        lse = mx[..., 0] + jnp.log(jnp.sum(jnp.exp(lg - mx), axis=-1))          # (TILE, N)
        cls = jax.lax.broadcasted_iota(jnp.int32, (TILE, N, C), 2)
        selected = jnp.sum(jnp.where(bin_idx[..., None] == cls, lg, 0.0), axis=-1)
        errors = lse - selected

        sq_mask = mr * mc                                                        # (TILE, N)
        num_ref[...] = jnp.sum(errors * sq_mask).reshape(1, 1, 1, 1)
        den_ref[...] = jnp.sum(sq_mask).reshape(1, 1, 1, 1)

    num, den = pl.pallas_call(
        kernel,
        out_shape=(jax.ShapeDtypeStruct((B, n_row, 1, 1), jnp.float32),
                   jax.ShapeDtypeStruct((B, n_row, 1, 1), jnp.float32)),
        grid=(B, n_row),
        in_specs=[pl.BlockSpec((1, TILE, N, C), lambda b, r: (b, r, 0, 0)),
                  pl.BlockSpec((1, TILE, 3), lambda b, r: (b, r, 0)),
                  pl.BlockSpec((1, 3, N), lambda b, r: (b, 0, 0)),
                  pl.BlockSpec((1, TILE, 1), lambda b, r: (b, r, 0)),
                  pl.BlockSpec((1, 1, N), lambda b, r: (b, 0, 0))],
        out_specs=(pl.BlockSpec((1, 1, 1, 1), lambda b, r: (b, r, 0, 0)),
                   pl.BlockSpec((1, 1, 1, 1), lambda b, r: (b, r, 0, 0))),
        compiler_params=pltpu.CompilerParams(
            dimension_semantics=("parallel", "parallel"),
            vmem_limit_bytes=56 * 1024 * 1024),
    )(lg16, pb, pbT, mrow, mcol)
    return jnp.sum(num[:, :, 0, 0], axis=1) / (eps + jnp.sum(den[:, :, 0, 0], axis=1))


# ------------------------------------ masked MSA loss ------------------------------------
def masked_msa_loss(logits, true_msa, bert_mask, *, eps, **_):
    B, S, N, C = logits.shape
    # channel-first (lane-dense: N on lanes) layout + bf16 streaming
    lg_cf = jnp.swapaxes(logits.astype(jnp.bfloat16), -1, -2)    # (B, S, C, N)
    true_msa = true_msa.astype(jnp.int32)
    bert_mask = bert_mask.astype(jnp.float32)

    c_pad = ((C + 7) // 8) * 8
    TS = _pick_tile(S, c_pad * N * 2, 4 << 20, cap=64)
    n_s = S // TS

    def kernel(lg_ref, tr_ref, m_ref, num_ref, den_ref):
        lg = lg_ref[0]                                   # (TS, C, N) bf16
        tr = tr_ref[0]                                   # (TS, N) int32
        m = m_ref[0]                                     # (TS, N) f32

        # fused cross-entropy unrolled over the C classes on lane-dense (TS, N) slices
        mx = lg[:, 0, :].astype(jnp.float32)
        for c in range(1, C):
            mx = jnp.maximum(mx, lg[:, c, :].astype(jnp.float32))
        ssum = jnp.zeros((TS, N), jnp.float32)
        sel = jnp.zeros((TS, N), jnp.float32)
        for c in range(C):
            lgc = lg[:, c, :].astype(jnp.float32)
            ssum = ssum + jnp.exp(lgc - mx)
            sel = sel + jnp.where(tr == c, lgc, 0.0)
        errors = mx + jnp.log(ssum) - sel                # (TS, N)

        num_ref[...] = jnp.sum(errors * m).reshape(1, 1, 1, 1)
        den_ref[...] = jnp.sum(m).reshape(1, 1, 1, 1)

    num, den = pl.pallas_call(
        kernel,
        out_shape=(jax.ShapeDtypeStruct((B, n_s, 1, 1), jnp.float32),
                   jax.ShapeDtypeStruct((B, n_s, 1, 1), jnp.float32)),
        grid=(B, n_s),
        in_specs=[pl.BlockSpec((1, TS, C, N), lambda b, s: (b, s, 0, 0)),
                  pl.BlockSpec((1, TS, N), lambda b, s: (b, s, 0)),
                  pl.BlockSpec((1, TS, N), lambda b, s: (b, s, 0))],
        out_specs=(pl.BlockSpec((1, 1, 1, 1), lambda b, s: (b, s, 0, 0)),
                   pl.BlockSpec((1, 1, 1, 1), lambda b, s: (b, s, 0, 0))),
        compiler_params=pltpu.CompilerParams(
            dimension_semantics=("parallel", "parallel"),
            vmem_limit_bytes=56 * 1024 * 1024),
    )(lg_cf, true_msa, bert_mask)
    return jnp.sum(num[:, :, 0, 0], axis=1) / (eps + jnp.sum(den[:, :, 0, 0], axis=1))


# ------------------- pLDDT + experimentally-resolved losses (fused, row-tiled) -------------------
def plddt_and_expres_loss(lddt_logits, all_atom_pred_pos, all_atom_positions, all_atom_mask,
                          exp_logits, atom37_atom_exists, resolution,
                          plddt_cfg, expres_cfg):
    B, N, C = lddt_logits.shape
    A = exp_logits.shape[-1]
    ca = 1  # residue_constants.atom_order["CA"]

    ca_pred = all_atom_pred_pos[..., ca, :].astype(jnp.float32)       # (B, N, 3)
    ca_true = all_atom_positions[..., ca, :].astype(jnp.float32)      # (B, N, 3)
    ca_predT = jnp.swapaxes(ca_pred, -1, -2)                          # (B, 3, N)
    ca_trueT = jnp.swapaxes(ca_true, -1, -2)                          # (B, 3, N)
    ca_mask_row = all_atom_mask[..., ca:ca + 1].astype(jnp.float32)   # (B, N, 1)
    ca_mask_col = jnp.swapaxes(ca_mask_row, -1, -2)                   # (B, 1, N)
    labels = all_atom_mask.astype(jnp.float32)                        # (B, N, 37)
    exists = atom37_atom_exists.astype(jnp.float32)                   # (B, N, 37)

    cutoff = plddt_cfg["cutoff"]
    num_bins = plddt_cfg["num_bins"]
    eps_p = plddt_cfg["eps"]
    eps_e = expres_cfg["eps"]

    TILE = _pick_tile(N, N * 4 * 12, 8 << 20, cap=128)   # ~12 live (TILE,N) f32 planes
    n_row = N // TILE

    def kernel(lg_ref, ppr_ref, ppT_ref, tpr_ref, tpT_ref, mr_ref, mc_ref,
               xl_ref, lab_ref, ex_ref, pnum_ref, pden_ref, enum_ref, eden_ref):
        r = pl.program_id(1)
        lg = lg_ref[0]                                    # (TILE, C)
        ppr = ppr_ref[0]                                  # (TILE, 3)
        ppT = ppT_ref[0]                                  # (3, N)
        tpr = tpr_ref[0]                                  # (TILE, 3)
        tpT = tpT_ref[0]                                  # (3, N)
        mr = mr_ref[0]                                    # (TILE, 1)
        mc = mc_ref[0]                                    # (1, N)

        # pairwise distances, accumulated per coordinate (no (TILE,N,3) temporary)
        d2t = jnp.zeros((TILE, N), jnp.float32)
        d2p = jnp.zeros((TILE, N), jnp.float32)
        for k in range(3):
            dt = tpr[:, k:k + 1] - tpT[k:k + 1, :]
            d2t = d2t + dt * dt
            dp = ppr[:, k:k + 1] - ppT[k:k + 1, :]
            d2p = d2p + dp * dp
        dmat_true = jnp.sqrt(eps_p + d2t)
        dmat_pred = jnp.sqrt(eps_p + d2p)

        row_idx = jax.lax.broadcasted_iota(jnp.int32, (TILE, N), 0) + r * TILE
        col_idx = jax.lax.broadcasted_iota(jnp.int32, (TILE, N), 1)
        not_eye = (row_idx != col_idx).astype(jnp.float32)
        dts = (dmat_true < cutoff).astype(jnp.float32) * mr * mc * not_eye
        l1 = jnp.abs(dmat_true - dmat_pred)
        score = 0.25 * ((l1 < 0.5).astype(jnp.float32) + (l1 < 1.0).astype(jnp.float32)
                        + (l1 < 2.0).astype(jnp.float32) + (l1 < 4.0).astype(jnp.float32))
        # exact divide: the quotient feeds the bin index (approx reciprocal can flip bins)
        lddt = (eps_p + jnp.sum(dts * score, axis=-1, keepdims=True)) / \
               (eps_p + jnp.sum(dts, axis=-1, keepdims=True))                    # (TILE, 1)
        bin_idx = jnp.minimum(jnp.floor(lddt * num_bins), num_bins - 1.0).astype(jnp.int32)

        # fused cross-entropy: lse - selected logit
        mx = jnp.max(lg, axis=-1, keepdims=True)                                 # (TILE, 1)
        lse = mx + jnp.log(jnp.sum(jnp.exp(lg - mx), axis=-1, keepdims=True))    # (TILE, 1)
        cls = jax.lax.broadcasted_iota(jnp.int32, (TILE, C), 1)
        selected = jnp.sum(jnp.where(bin_idx == cls, lg, 0.0), axis=-1, keepdims=True)
        errors = lse - selected
        pnum_ref[...] = jnp.sum(errors * mr).reshape(1, 1, 1, 1)
        pden_ref[...] = jnp.sum(mr).reshape(1, 1, 1, 1)

        # experimentally resolved: stable sigmoid cross entropy
        x = xl_ref[0]                                     # (TILE, 37)
        z = lab_ref[0]
        e = ex_ref[0]
        xe = jnp.maximum(x, 0.0) - x * z + jnp.log(1.0 + jnp.exp(-jnp.abs(x)))
        enum_ref[...] = jnp.sum(xe * e).reshape(1, 1, 1, 1)
        eden_ref[...] = jnp.sum(e).reshape(1, 1, 1, 1)

    pnum, pden, enum_, eden = pl.pallas_call(
        kernel,
        out_shape=tuple(jax.ShapeDtypeStruct((B, n_row, 1, 1), jnp.float32) for _ in range(4)),
        grid=(B, n_row),
        in_specs=[pl.BlockSpec((1, TILE, C), lambda b, r: (b, r, 0)),
                  pl.BlockSpec((1, TILE, 3), lambda b, r: (b, r, 0)),
                  pl.BlockSpec((1, 3, N), lambda b, r: (b, 0, 0)),
                  pl.BlockSpec((1, TILE, 3), lambda b, r: (b, r, 0)),
                  pl.BlockSpec((1, 3, N), lambda b, r: (b, 0, 0)),
                  pl.BlockSpec((1, TILE, 1), lambda b, r: (b, r, 0)),
                  pl.BlockSpec((1, 1, N), lambda b, r: (b, 0, 0)),
                  pl.BlockSpec((1, TILE, A), lambda b, r: (b, r, 0)),
                  pl.BlockSpec((1, TILE, A), lambda b, r: (b, r, 0)),
                  pl.BlockSpec((1, TILE, A), lambda b, r: (b, r, 0))],
        out_specs=tuple(pl.BlockSpec((1, 1, 1, 1), lambda b, r: (b, r, 0, 0)) for _ in range(4)),
        compiler_params=_PARAMS_2D,
    )(lddt_logits, ca_pred, ca_predT, ca_true, ca_trueT, ca_mask_row, ca_mask_col,
      exp_logits, labels, exists)

    plddt = jnp.sum(pnum[:, :, 0, 0], axis=1) / (eps_p + jnp.sum(pden[:, :, 0, 0], axis=1))
    expres = jnp.sum(enum_[:, :, 0, 0], axis=1) / (eps_e + jnp.sum(eden[:, :, 0, 0], axis=1))
    gate_p = ((resolution >= plddt_cfg["min_resolution"]) &
              (resolution <= plddt_cfg["max_resolution"])).astype(jnp.float32)
    gate_e = ((resolution >= expres_cfg["min_resolution"]) &
              (resolution <= expres_cfg["max_resolution"])).astype(jnp.float32)
    return plddt * gate_p, expres * gate_e


# ------------------------------------ backbone FAPE ------------------------------------
def _quat_to_rot(q):
    q = q / jnp.sqrt(jnp.sum(q * q, axis=-1, keepdims=True) + 1e-12)
    w, x, y, z = q[..., 0], q[..., 1], q[..., 2], q[..., 3]
    r0 = jnp.stack([1 - 2 * (y * y + z * z), 2 * (x * y - w * z), 2 * (x * z + w * y)], -1)
    r1 = jnp.stack([2 * (x * y + w * z), 1 - 2 * (x * x + z * z), 2 * (y * z - w * x)], -1)
    r2 = jnp.stack([2 * (x * z - w * y), 2 * (y * z + w * x), 1 - 2 * (x * x + y * y)], -1)
    return jnp.stack([r0, r1, r2], axis=-2)


def backbone_fape_loss(sm_frames, backbone_rigid_tensor, backbone_rigid_mask,
                       *, clamp_distance, length_scale, eps):
    # TODO(synk): always-clamped FAPE; use_clamped_fape blending not implemented.
    B, NB, N, _ = sm_frames.shape
    Rp = _quat_to_rot(sm_frames[..., :4])                      # (B, NB, N, 3, 3)
    tp = sm_frames[..., 4:]                                    # (B, NB, N, 3)  sublane layout
    Rg = backbone_rigid_tensor[..., :3, :3]                    # (B, N, 3, 3)
    tg = backbone_rigid_tensor[..., :3, 3]                     # (B, N, 3)      sublane layout

    # lane-dense layouts: rotations (9, N) with row 3k+c = R[., k, c]; translations (3, N); mask (1, N)
    rpT = jnp.transpose(Rp.reshape(B, NB, N, 9), (0, 1, 3, 2))  # (B, NB, 9, N)
    tpT = jnp.transpose(tp, (0, 1, 3, 2))                       # (B, NB, 3, N)
    rgT = jnp.transpose(Rg.reshape(B, N, 9), (0, 2, 1))         # (B, 9, N)
    tgT = jnp.transpose(tg, (0, 2, 1))                          # (B, 3, N)
    m_lane = backbone_rigid_mask.astype(jnp.float32)[:, None, :]  # (B, 1, N)
    m_sub = backbone_rigid_mask.astype(jnp.float32)[:, :, None]   # (B, N, 1)

    def kernel(rp_ref, tpl_ref, tps_ref, rg_ref, tgl_ref, tgs_ref, ml_ref, ms_ref, out_ref):
        rp = rp_ref[0, 0]                                      # (9, N)  rp[3k+c, i] = Rp_i[k, c]
        tpl = tpl_ref[0, 0]                                    # (3, N)  frame index i on lanes
        tps = tps_ref[0, 0]                                    # (N, 3)  point index j on sublanes
        rg = rg_ref[0]                                         # (9, N)
        tgl = tgl_ref[0]                                       # (3, N)
        tgs = tgs_ref[0]                                       # (N, 3)
        mrow = ml_ref[0]                                       # (1, N)  mask over frames i
        mcol = ms_ref[0]                                       # (N, 1)  mask over points j

        # c-invariant translation-difference planes: d[k][j, i] = t[k, j] - t[k, i]
        dps = [tps[:, k:k + 1] - tpl[k:k + 1, :] for k in range(3)]
        dgs = [tgs[:, k:k + 1] - tgl[k:k + 1, :] for k in range(3)]

        err2 = jnp.zeros((N, N), jnp.float32)
        for c in range(3):
            lp = rp[c:c + 1, :] * dps[0] + rp[3 + c:4 + c, :] * dps[1] + rp[6 + c:7 + c, :] * dps[2]
            lt = rg[c:c + 1, :] * dgs[0] + rg[3 + c:4 + c, :] * dgs[1] + rg[6 + c:7 + c, :] * dgs[2]
            d = lp - lt
            err2 = err2 + d * d

        dist = jnp.clip(jnp.sqrt(err2 + eps), 0.0, clamp_distance)
        normed = (dist / length_scale) * mcol * mrow
        sm = jnp.sum(mrow)
        out_ref[...] = (jnp.sum(normed) / (eps + sm) / (eps + sm)).reshape(1, 1, 1, 1)

    out = pl.pallas_call(
        kernel,
        out_shape=jax.ShapeDtypeStruct((B, NB, 1, 1), jnp.float32),
        grid=(B, NB),
        in_specs=[pl.BlockSpec((1, 1, 9, N), lambda b, nb: (b, nb, 0, 0)),
                  pl.BlockSpec((1, 1, 3, N), lambda b, nb: (b, nb, 0, 0)),
                  pl.BlockSpec((1, 1, N, 3), lambda b, nb: (b, nb, 0, 0)),
                  pl.BlockSpec((1, 9, N), lambda b, nb: (b, 0, 0)),   # GT resident across NB
                  pl.BlockSpec((1, 3, N), lambda b, nb: (b, 0, 0)),
                  pl.BlockSpec((1, N, 3), lambda b, nb: (b, 0, 0)),
                  pl.BlockSpec((1, 1, N), lambda b, nb: (b, 0, 0)),
                  pl.BlockSpec((1, N, 1), lambda b, nb: (b, 0, 0))],
        out_specs=pl.BlockSpec((1, 1, 1, 1), lambda b, nb: (b, nb, 0, 0)),
        compiler_params=_PARAMS_2D,   # keep NB parallel: it feeds the 2nd TC on v7x at B=1
    )(rpT, tpT, tp, rgT, tgT, tg, m_lane, m_sub)
    per_block = out[:, :, 0, 0]                               # (B, NB)
    return jnp.mean(per_block, axis=1)                        # average over trajectory blocks


# ---------------------------------- supervised chi loss ----------------------------------
def supervised_chi_loss(angles_sin_cos, unnormalized_angles_sin_cos, aatype, seq_mask, chi_mask,
                        chi_angles_sin_cos, *, chi_weight, angle_norm_weight, eps, **_):
    B, NB, N, _, _ = angles_sin_cos.shape
    pred = angles_sin_cos[..., 3:, :]                          # (B, NB, N, 4, 2)
    # lane-dense layouts: N on the last (lane) axis
    psin = jnp.transpose(pred[..., 0], (0, 1, 3, 2))           # (B, NB, 4, N)
    pcos = jnp.transpose(pred[..., 1], (0, 1, 3, 2))
    tsin = jnp.transpose(chi_angles_sin_cos[..., 0], (0, 2, 1))  # (B, 4, N)
    tcos = jnp.transpose(chi_angles_sin_cos[..., 1], (0, 2, 1))
    shift = jnp.transpose(1.0 - 2.0 * CHI_PI_PERIODIC[aatype], (0, 2, 1))   # (B, 4, N)
    chi_m = jnp.transpose(chi_mask.astype(jnp.float32), (0, 2, 1))          # (B, 4, N)
    usin = jnp.transpose(unnormalized_angles_sin_cos[..., 0], (0, 1, 3, 2))  # (B, NB, 7, N)
    ucos = jnp.transpose(unnormalized_angles_sin_cos[..., 1], (0, 1, 3, 2))
    seq_m = seq_mask.astype(jnp.float32)[:, None, :]                         # (B, 1, N)

    def kernel(ps_ref, pc_ref, ts_ref, tc_ref, sh_ref, cm_ref, us_ref, uc_ref, sm_ref, out_ref):
        ps, pc = ps_ref[0], pc_ref[0]                          # (NB, 4, N)
        ts, tc = ts_ref[0], tc_ref[0]                          # (4, N)
        sh, cm = sh_ref[0], cm_ref[0]                          # (4, N)
        us, uc = us_ref[0], uc_ref[0]                          # (NB, 7, N)
        sm = sm_ref[0]                                         # (1, N)
        sq = (ts[None] - ps) ** 2 + (tc[None] - pc) ** 2
        sq_sh = (sh[None] * ts[None] - ps) ** 2 + (sh[None] * tc[None] - pc) ** 2
        sq = jnp.minimum(sq, sq_sh)                            # (NB, 4, N)
        chi_l = jnp.sum(sq * cm[None]) / (MASKED_MEAN_EPS + NB * jnp.sum(cm))
        an = jnp.sqrt(us * us + uc * uc + eps)                 # (NB, 7, N)
        ne = jnp.abs(an - 1.0)
        norm_l = jnp.sum(ne * sm[None]) / (MASKED_MEAN_EPS + NB * 7.0 * jnp.sum(sm))
        out = chi_weight * chi_l + angle_norm_weight * norm_l
        out_ref[...] = out.reshape(1, 1, 1)

    out = pl.pallas_call(
        kernel,
        out_shape=jax.ShapeDtypeStruct((B, 1, 1), jnp.float32),
        grid=(B,),
        in_specs=[pl.BlockSpec((1, NB, 4, N), lambda b: (b, 0, 0, 0)),
                  pl.BlockSpec((1, NB, 4, N), lambda b: (b, 0, 0, 0)),
                  pl.BlockSpec((1, 4, N), lambda b: (b, 0, 0)),
                  pl.BlockSpec((1, 4, N), lambda b: (b, 0, 0)),
                  pl.BlockSpec((1, 4, N), lambda b: (b, 0, 0)),
                  pl.BlockSpec((1, 4, N), lambda b: (b, 0, 0)),
                  pl.BlockSpec((1, NB, 7, N), lambda b: (b, 0, 0, 0)),
                  pl.BlockSpec((1, NB, 7, N), lambda b: (b, 0, 0, 0)),
                  pl.BlockSpec((1, 1, N), lambda b: (b, 0, 0))],
        out_specs=pl.BlockSpec((1, 1, 1), lambda b: (b, 0, 0)),
        compiler_params=_PARAMS_1D,
    )(psin, pcos, tsin, tcos, shift, chi_m, usin, ucos, seq_m)
    return out[:, 0, 0]


# ------------------------------------ total AlphaFold loss ------------------------------------
def alphafold_loss(outputs, batch):
    B, N = batch["aatype"].shape

    losses = {}
    bb_fape = backbone_fape_loss(
        outputs["sm_frames"], batch["backbone_rigid_tensor"], batch["backbone_rigid_mask"],
        clamp_distance=FAPE_CFG["backbone_clamp_distance"],
        length_scale=FAPE_CFG["backbone_loss_unit_distance"], eps=FAPE_CFG["eps"])
    # TODO(synk): sidechain FAPE requires compute_renamed_ground_truth (atom14 rename tables); omitted.
    losses["fape"] = FAPE_CFG["backbone_weight"] * bb_fape
    losses["supervised_chi"] = supervised_chi_loss(
        outputs["sm_angles"], outputs["sm_unnormalized_angles"], batch["aatype"],
        batch["seq_mask"], batch["chi_mask"], batch["chi_angles_sin_cos"], **CHI_CFG)
    losses["distogram"] = distogram_loss(
        outputs["distogram_logits"], batch["pseudo_beta"], batch["pseudo_beta_mask"], **DIST_CFG)
    losses["masked_msa"] = masked_msa_loss(
        outputs["masked_msa_logits"], batch["true_msa"], batch["bert_mask"], **MSA_CFG)
    plddt_l, expres_l = plddt_and_expres_loss(
        outputs["lddt_logits"], outputs["final_atom_positions"], batch["all_atom_positions"],
        batch["all_atom_mask"], outputs["experimentally_resolved_logits"],
        batch["atom37_atom_exists"], batch["resolution"], PLDDT_CFG, EXPRES_CFG)
    losses["plddt_loss"] = plddt_l
    losses["experimentally_resolved"] = expres_l
    # TODO(synk): violation_loss needs find_structural_violations (residue constants); omitted.

    for v in losses.values():
        assert v.shape == (B,)

    weights = {"fape": FAPE_CFG["weight"], "supervised_chi": CHI_CFG["weight"],
               "distogram": DIST_CFG["weight"], "masked_msa": MSA_CFG["weight"],
               "plddt_loss": PLDDT_CFG["weight"], "experimentally_resolved": EXPRES_CFG["weight"]}
    weighted = {}
    for name, v in losses.items():
        wv = v * weights[name]
        # torch reference zeroes the WHOLE per-loss tensor if any entry is nan/inf
        wv = jnp.where(jnp.any(~jnp.isfinite(wv)), jnp.zeros_like(wv), wv)
        weighted[name] = wv
    weighted_total = sum(weighted.values())

    seq_length = batch["seq_length"].astype(jnp.float32)
    crop_size = jnp.ones_like(seq_length) * float(N)
    scale = jnp.sqrt(jnp.minimum(seq_length, crop_size))
    scaled_weighted_total = scale * weighted_total

    loss_scalars = {k: jnp.mean(v) for k, v in losses.items()}
    loss_scalars["weighted_total_loss"] = jnp.mean(weighted_total)
    loss_scalars["scaled_weighted_total_loss"] = jnp.mean(scaled_weighted_total)
    return jnp.mean(scaled_weighted_total), loss_scalars


# -------------------------------------------- main --------------------------------------------
if __name__ == "__main__":
    B, N, NB, S = 2, 8, 2, 4          # batch, residues, structure-module blocks, MSA rows
    key = jax.random.PRNGKey(0)
    ks = jax.random.split(key, 24)

    # ground-truth backbone rigids (valid rotation + translation, 4x4)
    gt_q = jax.random.normal(ks[0], (B, N, 4), jnp.float32)
    gt_R = _quat_to_rot(gt_q)
    gt_t = jax.random.normal(ks[1], (B, N, 3), jnp.float32)
    top = jnp.concatenate([gt_R, gt_t[..., None]], axis=-1)                       # (B, N, 3, 4)
    bottom = jnp.broadcast_to(jnp.array([0.0, 0.0, 0.0, 1.0], jnp.float32), (B, N, 1, 4))
    backbone_rigid_tensor = jnp.concatenate([top, bottom], axis=-2)               # (B, N, 4, 4)

    outputs = {
        "sm_frames": jax.random.normal(ks[2], (B, NB, N, 7), jnp.float32),
        "sm_angles": jax.random.normal(ks[3], (B, NB, N, 7, 2), jnp.float32),
        "sm_unnormalized_angles": jax.random.normal(ks[4], (B, NB, N, 7, 2), jnp.float32),
        "distogram_logits": jax.random.normal(ks[5], (B, N, N, 64), jnp.float32),
        "masked_msa_logits": jax.random.normal(ks[6], (B, S, N, 23), jnp.float32),
        "lddt_logits": jax.random.normal(ks[7], (B, N, 50), jnp.float32),
        "final_atom_positions": jax.random.normal(ks[8], (B, N, 37, 3), jnp.float32),
        "experimentally_resolved_logits": jax.random.normal(ks[9], (B, N, 37), jnp.float32),
    }
    batch = {
        "aatype": jax.random.randint(ks[10], (B, N), 0, 21, jnp.int32),
        "seq_mask": jax.random.bernoulli(ks[11], 0.9, (B, N)).astype(jnp.float32),
        "chi_mask": jax.random.bernoulli(ks[12], 0.8, (B, N, 4)).astype(jnp.float32),
        "chi_angles_sin_cos": jax.random.normal(ks[13], (B, N, 4, 2), jnp.float32),
        "pseudo_beta": 3.0 * jax.random.normal(ks[14], (B, N, 3), jnp.float32),
        "pseudo_beta_mask": jax.random.bernoulli(ks[15], 0.9, (B, N)).astype(jnp.float32),
        "true_msa": jax.random.randint(ks[16], (B, S, N), 0, 23, jnp.int32),
        "bert_mask": jax.random.bernoulli(ks[17], 0.5, (B, S, N)).astype(jnp.float32),
        "all_atom_positions": jax.random.normal(ks[18], (B, N, 37, 3), jnp.float32),
        "all_atom_mask": jax.random.bernoulli(ks[19], 0.9, (B, N, 37)).astype(jnp.float32),
        "atom37_atom_exists": jax.random.bernoulli(ks[20], 0.9, (B, N, 37)).astype(jnp.float32),
        "resolution": jnp.array([1.5, 2.5], jnp.float32),
        "backbone_rigid_tensor": backbone_rigid_tensor,
        "backbone_rigid_mask": jax.random.bernoulli(ks[21], 0.9, (B, N)).astype(jnp.float32),
        "seq_length": jnp.array([6, 8], jnp.int32),
    }

    total, loss_dict = alphafold_loss(outputs, batch)
    total = jax.block_until_ready(total)
    loss_dict = jax.tree_util.tree_map(jax.block_until_ready, loss_dict)
    assert jnp.isfinite(total)
    print("KERNEL_OK")
</pallas_src>

<mosaic_0001>
module attributes {stable_mosaic.version = 11 : i64} {
  func.func @kernel(%arg0: i32, %arg1: i32, %arg2: memref<1x1x9x8xf32, #tpu.memory_space<vmem>>, %arg3: memref<1x1x3x8xf32, #tpu.memory_space<vmem>>, %arg4: memref<1x1x8x3xf32, #tpu.memory_space<vmem>>, %arg5: memref<1x9x8xf32, #tpu.memory_space<vmem>>, %arg6: memref<1x3x8xf32, #tpu.memory_space<vmem>>, %arg7: memref<1x8x3xf32, #tpu.memory_space<vmem>>, %arg8: memref<1x1x8xf32, #tpu.memory_space<vmem>>, %arg9: memref<1x8x1xf32, #tpu.memory_space<vmem>>, %arg10: memref<1x1x1x1xf32, #tpu.memory_space<vmem>>) attributes {dimension_semantics = [#tpu.dimension_semantics<parallel>, #tpu.dimension_semantics<parallel>], iteration_bounds = array<i64: 2, 2>, scalar_prefetch = 0 : i64, scratch_operands = 0 : i64, tpu.core_type = #tpu.core_type<tc>, window_params = [{transform_indices = @transform_0, window_bounds = array<i64: 1, 1, 9, 8>}, {transform_indices = @transform_1, window_bounds = array<i64: 1, 1, 3, 8>}, {transform_indices = @transform_2, window_bounds = array<i64: 1, 1, 8, 3>}, {transform_indices = @transform_3, window_bounds = array<i64: 1, 9, 8>}, {transform_indices = @transform_4, window_bounds = array<i64: 1, 3, 8>}, {transform_indices = @transform_5, window_bounds = array<i64: 1, 8, 3>}, {transform_indices = @transform_6, window_bounds = array<i64: 1, 1, 8>}, {transform_indices = @transform_7, window_bounds = array<i64: 1, 8, 1>}, {transform_indices = @transform_8, window_bounds = array<i64: 1, 1, 1, 1>}]} {
    %c0 = arith.constant 0 : index
    %c0_0 = arith.constant 0 : index
    %c0_1 = arith.constant 0 : index
    %c0_2 = arith.constant 0 : index
    %0 = vector.load %arg2[%c0, %c0_0, %c0_1, %c0_2] : memref<1x1x9x8xf32, #tpu.memory_space<vmem>>, vector<1x1x9x8xf32>
    %1 = vector.shape_cast %0 : vector<1x1x9x8xf32> to vector<9x8xf32>
    %c0_3 = arith.constant 0 : index
    %c0_4 = arith.constant 0 : index
    %c0_5 = arith.constant 0 : index
    %c0_6 = arith.constant 0 : index
    %2 = vector.load %arg3[%c0_3, %c0_4, %c0_5, %c0_6] : memref<1x1x3x8xf32, #tpu.memory_space<vmem>>, vector<1x1x3x8xf32>
    %3 = vector.shape_cast %2 : vector<1x1x3x8xf32> to vector<3x8xf32>
    %c0_7 = arith.constant 0 : index
    %c0_8 = arith.constant 0 : index
    %c0_9 = arith.constant 0 : index
    %c0_10 = arith.constant 0 : index
    %4 = vector.load %arg4[%c0_7, %c0_8, %c0_9, %c0_10] : memref<1x1x8x3xf32, #tpu.memory_space<vmem>>, vector<1x1x8x3xf32>
    %5 = vector.shape_cast %4 : vector<1x1x8x3xf32> to vector<8x3xf32>
    %c0_11 = arith.constant 0 : index
    %c0_12 = arith.constant 0 : index
    %c0_13 = arith.constant 0 : index
    %6 = vector.load %arg5[%c0_11, %c0_12, %c0_13] : memref<1x9x8xf32, #tpu.memory_space<vmem>>, vector<1x9x8xf32>
    %7 = vector.shape_cast %6 : vector<1x9x8xf32> to vector<9x8xf32>
    %c0_14 = arith.constant 0 : index
    %c0_15 = arith.constant 0 : index
    %c0_16 = arith.constant 0 : index
    %8 = vector.load %arg6[%c0_14, %c0_15, %c0_16] : memref<1x3x8xf32, #tpu.memory_space<vmem>>, vector<1x3x8xf32>
    %9 = vector.shape_cast %8 : vector<1x3x8xf32> to vector<3x8xf32>
    %c0_17 = arith.constant 0 : index
    %c0_18 = arith.constant 0 : index
    %c0_19 = arith.constant 0 : index
    %10 = vector.load %arg7[%c0_17, %c0_18, %c0_19] : memref<1x8x3xf32, #tpu.memory_space<vmem>>, vector<1x8x3xf32>
    %11 = vector.shape_cast %10 : vector<1x8x3xf32> to vector<8x3xf32>
    %c0_20 = arith.constant 0 : index
    %c0_21 = arith.constant 0 : index
    %c0_22 = arith.constant 0 : index
    %12 = vector.load %arg8[%c0_20, %c0_21, %c0_22] : memref<1x1x8xf32, #tpu.memory_space<vmem>>, vector<1x1x8xf32>
    %13 = vector.shape_cast %12 : vector<1x1x8xf32> to vector<1x8xf32>
    %c0_23 = arith.constant 0 : index
    %c0_24 = arith.constant 0 : index
    %c0_25 = arith.constant 0 : index
    %14 = vector.load %arg9[%c0_23, %c0_24, %c0_25] : memref<1x8x1xf32, #tpu.memory_space<vmem>>, vector<1x8x1xf32>
    %15 = vector.shape_cast %14 : vector<1x8x1xf32> to vector<8x1xf32>
    %16 = vector.extract_strided_slice %5 {offsets = [0, 0], sizes = [8, 1], strides = [1, 1]} : vector<8x3xf32> to vector<8x1xf32>
    %17 = vector.extract_strided_slice %3 {offsets = [0, 0], sizes = [1, 8], strides = [1, 1]} : vector<3x8xf32> to vector<1x8xf32>
    %18 = vector.broadcast %16 : vector<8x1xf32> to vector<8x8xf32>
    %19 = vector.broadcast %17 : vector<1x8xf32> to vector<8x8xf32>
    %20 = arith.subf %18, %19 : vector<8x8xf32>
    %21 = vector.extract_strided_slice %5 {offsets = [0, 1], sizes = [8, 1], strides = [1, 1]} : vector<8x3xf32> to vector<8x1xf32>
    %22 = vector.extract_strided_slice %3 {offsets = [1, 0], sizes = [1, 8], strides = [1, 1]} : vector<3x8xf32> to vector<1x8xf32>
    %23 = vector.broadcast %21 : vector<8x1xf32> to vector<8x8xf32>
    %24 = vector.broadcast %22 : vector<1x8xf32> to vector<8x8xf32>
    %25 = arith.subf %23, %24 : vector<8x8xf32>
    %26 = vector.extract_strided_slice %5 {offsets = [0, 2], sizes = [8, 1], strides = [1, 1]} : vector<8x3xf32> to vector<8x1xf32>
    %27 = vector.extract_strided_slice %3 {offsets = [2, 0], sizes = [1, 8], strides = [1, 1]} : vector<3x8xf32> to vector<1x8xf32>
    %28 = vector.broadcast %26 : vector<8x1xf32> to vector<8x8xf32>
    %29 = vector.broadcast %27 : vector<1x8xf32> to vector<8x8xf32>
    %30 = arith.subf %28, %29 : vector<8x8xf32>
    %31 = vector.extract_strided_slice %11 {offsets = [0, 0], sizes = [8, 1], strides = [1, 1]} : vector<8x3xf32> to vector<8x1xf32>
    %32 = vector.extract_strided_slice %9 {offsets = [0, 0], sizes = [1, 8], strides = [1, 1]} : vector<3x8xf32> to vector<1x8xf32>
    %33 = vector.broadcast %31 : vector<8x1xf32> to vector<8x8xf32>
    %34 = vector.broadcast %32 : vector<1x8xf32> to vector<8x8xf32>
    %35 = arith.subf %33, %34 : vector<8x8xf32>
    %36 = vector.extract_strided_slice %11 {offsets = [0, 1], sizes = [8, 1], strides = [1, 1]} : vector<8x3xf32> to vector<8x1xf32>
    %37 = vector.extract_strided_slice %9 {offsets = [1, 0], sizes = [1, 8], strides = [1, 1]} : vector<3x8xf32> to vector<1x8xf32>
    %38 = vector.broadcast %36 : vector<8x1xf32> to vector<8x8xf32>
    %39 = vector.broadcast %37 : vector<1x8xf32> to vector<8x8xf32>
    %40 = arith.subf %38, %39 : vector<8x8xf32>
    %41 = vector.extract_strided_slice %11 {offsets = [0, 2], sizes = [8, 1], strides = [1, 1]} : vector<8x3xf32> to vector<8x1xf32>
    %42 = vector.extract_strided_slice %9 {offsets = [2, 0], sizes = [1, 8], strides = [1, 1]} : vector<3x8xf32> to vector<1x8xf32>
    %43 = vector.broadcast %41 : vector<8x1xf32> to vector<8x8xf32>
    %44 = vector.broadcast %42 : vector<1x8xf32> to vector<8x8xf32>
    %45 = arith.subf %43, %44 : vector<8x8xf32>
    %cst = arith.constant 0.000000e+00 : f32
    %46 = vector.broadcast %cst : f32 to vector<8x8xf32>
    %47 = vector.extract_strided_slice %1 {offsets = [0, 0], sizes = [1, 8], strides = [1, 1]} : vector<9x8xf32> to vector<1x8xf32>
    %48 = vector.broadcast %47 : vector<1x8xf32> to vector<8x8xf32>
    %49 = arith.mulf %48, %20 : vector<8x8xf32>
    %50 = vector.extract_strided_slice %1 {offsets = [3, 0], sizes = [1, 8], strides = [1, 1]} : vector<9x8xf32> to vector<1x8xf32>
    %51 = vector.broadcast %50 : vector<1x8xf32> to vector<8x8xf32>
    %52 = arith.mulf %51, %25 : vector<8x8xf32>
    %53 = arith.addf %49, %52 : vector<8x8xf32>
    %54 = vector.extract_strided_slice %1 {offsets = [6, 0], sizes = [1, 8], strides = [1, 1]} : vector<9x8xf32> to vector<1x8xf32>
    %55 = vector.broadcast %54 : vector<1x8xf32> to vector<8x8xf32>
    %56 = arith.mulf %55, %30 : vector<8x8xf32>
    %57 = arith.addf %53, %56 : vector<8x8xf32>
    %58 = vector.extract_strided_slice %7 {offsets = [0, 0], sizes = [1, 8], strides = [1, 1]} : vector<9x8xf32> to vector<1x8xf32>
    %59 = vector.broadcast %58 : vector<1x8xf32> to vector<8x8xf32>
    %60 = arith.mulf %59, %35 : vector<8x8xf32>
    %61 = vector.extract_strided_slice %7 {offsets = [3, 0], sizes = [1, 8], strides = [1, 1]} : vector<9x8xf32> to vector<1x8xf32>
    %62 = vector.broadcast %61 : vector<1x8xf32> to vector<8x8xf32>
    %63 = arith.mulf %62, %40 : vector<8x8xf32>
    %64 = arith.addf %60, %63 : vector<8x8xf32>
    %65 = vector.extract_strided_slice %7 {offsets = [6, 0], sizes = [1, 8], strides = [1, 1]} : vector<9x8xf32> to vector<1x8xf32>
    %66 = vector.broadcast %65 : vector<1x8xf32> to vector<8x8xf32>
    %67 = arith.mulf %66, %45 : vector<8x8xf32>
    %68 = arith.addf %64, %67 : vector<8x8xf32>
    %69 = arith.subf %57, %68 : vector<8x8xf32>
    %70 = arith.mulf %69, %69 : vector<8x8xf32>
    %71 = arith.addf %46, %70 : vector<8x8xf32>
    %72 = vector.extract_strided_slice %1 {offsets = [1, 0], sizes = [1, 8], strides = [1, 1]} : vector<9x8xf32> to vector<1x8xf32>
    %73 = vector.broadcast %72 : vector<1x8xf32> to vector<8x8xf32>
    %74 = arith.mulf %73, %20 : vector<8x8xf32>
    %75 = vector.extract_strided_slice %1 {offsets = [4, 0], sizes = [1, 8], strides = [1, 1]} : vector<9x8xf32> to vector<1x8xf32>
    %76 = vector.broadcast %75 : vector<1x8xf32> to vector<8x8xf32>
    %77 = arith.mulf %76, %25 : vector<8x8xf32>
    %78 = arith.addf %74, %77 : vector<8x8xf32>
    %79 = vector.extract_strided_slice %1 {offsets = [7, 0], sizes = [1, 8], strides = [1, 1]} : vector<9x8xf32> to vector<1x8xf32>
    %80 = vector.broadcast %79 : vector<1x8xf32> to vector<8x8xf32>
    %81 = arith.mulf %80, %30 : vector<8x8xf32>
    %82 = arith.addf %78, %81 : vector<8x8xf32>
    %83 = vector.extract_strided_slice %7 {offsets = [1, 0], sizes = [1, 8], strides = [1, 1]} : vector<9x8xf32> to vector<1x8xf32>
    %84 = vector.broadcast %83 : vector<1x8xf32> to vector<8x8xf32>
    %85 = arith.mulf %84, %35 : vector<8x8xf32>
    %86 = vector.extract_strided_slice %7 {offsets = [4, 0], sizes = [1, 8], strides = [1, 1]} : vector<9x8xf32> to vector<1x8xf32>
    %87 = vector.broadcast %86 : vector<1x8xf32> to vector<8x8xf32>
    %88 = arith.mulf %87, %40 : vector<8x8xf32>
    %89 = arith.addf %85, %88 : vector<8x8xf32>
    %90 = vector.extract_strided_slice %7 {offsets = [7, 0], sizes = [1, 8], strides = [1, 1]} : vector<9x8xf32> to vector<1x8xf32>
    %91 = vector.broadcast %90 : vector<1x8xf32> to vector<8x8xf32>
    %92 = arith.mulf %91, %45 : vector<8x8xf32>
    %93 = arith.addf %89, %92 : vector<8x8xf32>
    %94 = arith.subf %82, %93 : vector<8x8xf32>
    %95 = arith.mulf %94, %94 : vector<8x8xf32>
    %96 = arith.addf %71, %95 : vector<8x8xf32>
    %97 = vector.extract_strided_slice %1 {offsets = [2, 0], sizes = [1, 8], strides = [1, 1]} : vector<9x8xf32> to vector<1x8xf32>
    %98 = vector.broadcast %97 : vector<1x8xf32> to vector<8x8xf32>
    %99 = arith.mulf %98, %20 : vector<8x8xf32>
    %100 = vector.extract_strided_slice %1 {offsets = [5, 0], sizes = [1, 8], strides = [1, 1]} : vector<9x8xf32> to vector<1x8xf32>
    %101 = vector.broadcast %100 : vector<1x8xf32> to vector<8x8xf32>
    %102 = arith.mulf %101, %25 : vector<8x8xf32>
    %103 = arith.addf %99, %102 : vector<8x8xf32>
    %104 = vector.extract_strided_slice %1 {offsets = [8, 0], sizes = [1, 8], strides = [1, 1]} : vector<9x8xf32> to vector<1x8xf32>
    %105 = vector.broadcast %104 : vector<1x8xf32> to vector<8x8xf32>
    %106 = arith.mulf %105, %30 : vector<8x8xf32>
    %107 = arith.addf %103, %106 : vector<8x8xf32>
    %108 = vector.extract_strided_slice %7 {offsets = [2, 0], sizes = [1, 8], strides = [1, 1]} : vector<9x8xf32> to vector<1x8xf32>
    %109 = vector.broadcast %108 : vector<1x8xf32> to vector<8x8xf32>
    %110 = arith.mulf %109, %35 : vector<8x8xf32>
    %111 = vector.extract_strided_slice %7 {offsets = [5, 0], sizes = [1, 8], strides = [1, 1]} : vector<9x8xf32> to vector<1x8xf32>
    %112 = vector.broadcast %111 : vector<1x8xf32> to vector<8x8xf32>
    %113 = arith.mulf %112, %40 : vector<8x8xf32>
    %114 = arith.addf %110, %113 : vector<8x8xf32>
    %115 = vector.extract_strided_slice %7 {offsets = [8, 0], sizes = [1, 8], strides = [1, 1]} : vector<9x8xf32> to vector<1x8xf32>
    %116 = vector.broadcast %115 : vector<1x8xf32> to vector<8x8xf32>
    %117 = arith.mulf %116, %45 : vector<8x8xf32>
    %118 = arith.addf %114, %117 : vector<8x8xf32>
    %119 = arith.subf %107, %118 : vector<8x8xf32>
    %120 = arith.mulf %119, %119 : vector<8x8xf32>
    %121 = arith.addf %96, %120 : vector<8x8xf32>
    %cst_26 = arith.constant 9.99999974E-5 : f32
    %122 = vector.broadcast %cst_26 : f32 to vector<8x8xf32>
    %123 = arith.addf %121, %122 : vector<8x8xf32>
    %124 = math.sqrt %123 : vector<8x8xf32>
    %cst_27 = arith.constant 0.000000e+00 : f32
    %cst_28 = arith.constant 1.000000e+01 : f32
    %125 = vector.broadcast %cst_27 : f32 to vector<8x8xf32>
    %126 = arith.maximumf %125, %124 : vector<8x8xf32>
    %127 = vector.broadcast %cst_28 : f32 to vector<8x8xf32>
    %128 = arith.minimumf %127, %126 : vector<8x8xf32>
    %cst_29 = arith.constant 1.000000e+01 : f32
    %129 = vector.broadcast %cst_29 : f32 to vector<8x8xf32>
    %130 = arith.divf %128, %129 : vector<8x8xf32>
    %131 = vector.broadcast %15 : vector<8x1xf32> to vector<8x8xf32>
    %132 = arith.mulf %130, %131 : vector<8x8xf32>
    %133 = vector.broadcast %13 : vector<1x8xf32> to vector<8x8xf32>
    %134 = arith.mulf %132, %133 : vector<8x8xf32>
    %135 = vector.shape_cast %13 : vector<1x8xf32> to vector<1x1x8xf32>
    %cst_30 = arith.constant dense<0.000000e+00> : vector<1xf32>
    %136 = vector.multi_reduction <add>, %135, %cst_30 [1, 2] : vector<1x1x8xf32> to vector<1xf32>
    %137 = vector.shape_cast %136 : vector<1xf32> to vector<1x1x1xf32>
    %138 = vector.extract %137[0, 0, 0] : f32 from vector<1x1x1xf32>
    %139 = vector.shape_cast %134 : vector<8x8xf32> to vector<1x8x8xf32>
    %cst_31 = arith.constant dense<0.000000e+00> : vector<1xf32>
    %140 = vector.multi_reduction <add>, %139, %cst_31 [1, 2] : vector<1x8x8xf32> to vector<1xf32>
    %141 = vector.shape_cast %140 : vector<1xf32> to vector<1x1x1xf32>
    %142 = vector.extract %141[0, 0, 0] : f32 from vector<1x1x1xf32>
    %cst_32 = arith.constant 9.99999974E-5 : f32
    %143 = arith.addf %cst_32, %138 : f32
    %144 = arith.divf %142, %143 : f32
    %cst_33 = arith.constant 9.99999974E-5 : f32
    %145 = arith.addf %cst_33, %138 : f32
    %146 = arith.divf %144, %145 : f32
    %147 = vector.broadcast %146 : f32 to vector<1x1x1x1xf32>
    %c0_34 = arith.constant 0 : index
    %c0_35 = arith.constant 0 : index
    %c0_36 = arith.constant 0 : index
    %c0_37 = arith.constant 0 : index
    %148 = vector.load %arg10[%c0_34, %c0_35, %c0_36, %c0_37] : memref<1x1x1x1xf32, #tpu.memory_space<vmem>>, vector<1x1x1x1xf32>
    tpu.vector_store %arg10[%c0_34, %c0_35, %c0_36, %c0_37], %147 {strides = array<i32>} : memref<1x1x1x1xf32, #tpu.memory_space<vmem>>, vector<1x1x1x1xf32>,
    return
  }
  func.func @transform_0(%arg0: i32, %arg1: i32) -> (i32, i32, i32, i32) {
    %c0_i32 = arith.constant 0 : i32
    %c0_i32_0 = arith.constant 0 : i32
    %c0_i32_1 = arith.constant 0 : i32
    return %arg0, %arg1, %c0_i32, %c0_i32_0 : i32, i32, i32, i32
  }
  func.func @transform_1(%arg0: i32, %arg1: i32) -> (i32, i32, i32, i32) {
    %c0_i32 = arith.constant 0 : i32
    %c0_i32_0 = arith.constant 0 : i32
    %c0_i32_1 = arith.constant 0 : i32
    return %arg0, %arg1, %c0_i32, %c0_i32_0 : i32, i32, i32, i32
  }
  func.func @transform_2(%arg0: i32, %arg1: i32) -> (i32, i32, i32, i32) {
    %c0_i32 = arith.constant 0 : i32
    %c0_i32_0 = arith.constant 0 : i32
    %c0_i32_1 = arith.constant 0 : i32
    return %arg0, %arg1, %c0_i32, %c0_i32_0 : i32, i32, i32, i32
  }
  func.func @transform_3(%arg0: i32, %arg1: i32) -> (i32, i32, i32) {
    %c0_i32 = arith.constant 0 : i32
    %c0_i32_0 = arith.constant 0 : i32
    %c0_i32_1 = arith.constant 0 : i32
    return %arg0, %c0_i32, %c0_i32_0 : i32, i32, i32
  }
  func.func @transform_4(%arg0: i32, %arg1: i32) -> (i32, i32, i32) {
    %c0_i32 = arith.constant 0 : i32
    %c0_i32_0 = arith.constant 0 : i32
    %c0_i32_1 = arith.constant 0 : i32
    return %arg0, %c0_i32, %c0_i32_0 : i32, i32, i32
  }
  func.func @transform_5(%arg0: i32, %arg1: i32) -> (i32, i32, i32) {
    %c0_i32 = arith.constant 0 : i32
    %c0_i32_0 = arith.constant 0 : i32
    %c0_i32_1 = arith.constant 0 : i32
    return %arg0, %c0_i32, %c0_i32_0 : i32, i32, i32
  }
  func.func @transform_6(%arg0: i32, %arg1: i32) -> (i32, i32, i32) {
    %c0_i32 = arith.constant 0 : i32
    %c0_i32_0 = arith.constant 0 : i32
    %c0_i32_1 = arith.constant 0 : i32
    return %arg0, %c0_i32, %c0_i32_0 : i32, i32, i32
  }
  func.func @transform_7(%arg0: i32, %arg1: i32) -> (i32, i32, i32) {
    %c0_i32 = arith.constant 0 : i32
    %c0_i32_0 = arith.constant 0 : i32
    %c0_i32_1 = arith.constant 0 : i32
    return %arg0, %c0_i32, %c0_i32_0 : i32, i32, i32
  }
  func.func @transform_8(%arg0: i32, %arg1: i32) -> (i32, i32, i32, i32) {
    %c0_i32 = arith.constant 0 : i32
    %c0_i32_0 = arith.constant 0 : i32
    %c0_i32_1 = arith.constant 0 : i32
    return %arg0, %arg1, %c0_i32, %c0_i32_0 : i32, i32, i32, i32
  }
}

</mosaic_0001>

<bundles_post_ra>
// kernel: tpu_custom_call.1
= control target key start
LH: loop header
LB: loop body
LE: loop exit
PB: predicated region body
PF: predicated region fallthrough
CT: control target
= control target key end

     0   :  { %s1069_s27 = smov 0   ;;  %s1071_s28 = smov 0   ;;  %s1185_s0 = inlined_call_operand.vmem [shape: f32[2,2,9,8], index: 0, kind: input, shape index: {}]   ;;  %s1186_s1 = inlined_call_operand.vmem [shape: f32[2,2,3,8], index: 1, kind: input, shape index: {}]   ;;  %s1187_s2 = inlined_call_operand.vmem [shape: f32[2,2,8,3], index: 2, kind: input, shape index: {}]   ;;  %s1188_s3 = inlined_call_operand.vmem [shape: f32[2,9,8], index: 3, kind: input, shape index: {}]   ;;  %s1189_s4 = inlined_call_operand.vmem [shape: f32[2,3,8], index: 4, kind: input, shape index: {}]   ;;  %s1190_s5 = inlined_call_operand.vmem [shape: f32[2,8,3], index: 5, kind: input, shape index: {}]   ;;  %s1191_s6 = inlined_call_operand.vmem [shape: f32[2,1,8], index: 6, kind: input, shape index: {}]   ;;  %s1192_s7 = inlined_call_operand.vmem [shape: f32[2,8,1], index: 7, kind: input, shape index: {}]   ;;  %s1193_s8 = inlined_call_operand.vmem [shape: f32[2,2,1,1], index: 8, kind: output, shape index: {}]  }
   0x1   :  { %1194 = sst [smem:[#allocation2_spill]] %s1187_s2  ;;  %s1073_s29 = smov 0  }
   0x2   :  { %s1075_s30 = smov 0   ;;  %s1077_s9 = smov 0  }
   0x3 LB: > { %s27_s10 = sadd.s32 1, %s1011_s29  ;;  %s30_s11 = sadd.s32 1, %s1015_s30  ;;  %s1019_s9 = sphi %s1077_s9, %s18_s9   ;;  %s1015_s30 = sphi %s1075_s30, %s1199_s30   ;;  %s1011_s29 = sphi %s1073_s29, %s1198_s29   ;;  %s1007_s28 = sphi %s1071_s28, %s1197_s28   ;;  %s1003_s27 = sphi %s1069_s27, %s1196_s27  }
   0x4   : > { %p28_p0 = scmp.ge.s32.totalorder %s27_s10, 2  ;;  %p901_p1 = scmp.ge.s32.totalorder %s1019_s9, 1 }
   0x5   : > { %p357_p2 = scmp.lt.s32.totalorder %s1019_s9, 5 }
   0x6   : > { %s1201_s10 = smov (%p28_p0, %s27_s10), 0  ;;  %s1203_s11 = smov (!%p28_p0, %s30_s11), %s1015_s30 }
   0x7   : > { %p358_p3 = pnand %p901_p1, %p357_p2  ;;  %p32_p4 = scmp.ge.s32.totalorder %s1203_s11, 2 }
   0x8   : > { %p433_p5 = scmp.lt.s32.totalorder (!%p358_p3), %s1007_s28, 1  ;;  %p435_p6 = scmp.lt.s32.totalorder (!%p358_p3), %s1003_s27, 1  ;;  %v1021_v0 = vmov (!%p358_p3), 0   ;;  %v1022_v3 = vmov (!%p358_p3), 1   ;;  %v1023_v4 = vmov (!%p358_p3), 2   ;;  %vm687_vm0 = vcmask (!%p358_p3), 57344  }
   0x9   : > { %s1205_s11 = smov (%p32_p4, %s1203_s11), 0  ;;  %361 = sbr.rel (%p358_p3) target bundleno = 413 (0x19d), region = 52 }
   0xa   : > { %969 = vset.pattern.permute.xlu1 (!%p358_p3), %v1021_v0  ;;  %971 = vset.pattern.permute.xlu0 (!%p358_p3), %v1021_v0  ;;  %s1195_s2 = sld [smem:[#allocation2_spill]] (!%p358_p3)  ;;  %v500_v8 = vlaneseq (!%p358_p3)  ;;  %vm698_vm3 = vcmask (!%p358_p3), 64512   ;;  %vm719_vm4 = vcmask (!%p358_p3), 0  }
   0xc   : > { %v501_v9 = vshrl.u32 (!%p358_p3), %v500_v8, 7 }
   0xe   : > { %v1138_v10 = vsub.s32 (!%p358_p3), 0, %v501_v9  ;;  %v511_v11 = vsub.s32 (!%p358_p3), 1, %v501_v9  ;;  %v1150_v13 = vsub.s32 (!%p358_p3), 2, %v501_v9  ;;  %v558_v17 = vsub.s32 (!%p358_p3), 3, %v501_v9 }
   0xf   : > { %v595_v24 = vsub.s32 (!%p358_p3), 4, %v501_v9  ;;  %v632_v25 = vsub.s32 (!%p358_p3), 5, %v501_v9  ;;  %v564_v29 = vsub.s32 (!%p358_p3), 6, %v501_v9  ;;  %v601_v34 = vsub.s32 (!%p358_p3), 7, %v501_v9 }
  0x10   : > { %s1207_s28 = smov (!%p433_p5, %s1007_s28), 1  ;;  %s1209_s27 = smov (!%p435_p6, %s1003_s27), 1 }
  0x11   : > { %s912_s12 = sshll.u32 %s1207_s28, 3  ;;  %s905_s13 = sshll.u32 %s1207_s28, 1 }
  0x12   : > { %s470_s16 = scalar_lea.vmem %s1190_s5, %s912_s12  ;;  %s1106_s17 = sadd.s32 %s905_s13, %s1209_s27 }
  0x13   : > { %v492_v1 = vld [vmem:[%s470_s16] sm:$0xff]  ;;  %s908_s18 = sshll.u32 %s1106_s17, 3  ;;  %s902_s22 = sshll.u32 %s1209_s27, 1 }
  0x14   : > { %525 = vperm.xlu1 %969, %v492_v1   ;;  %s457_s21 = scalar_lea.vmem %s1195_s2, %s908_s18  ;;  %s903_s23 = sshll.u32 %s1207_s28, 2 }
  0x15   : > { %v488_v2 = vld [vmem:[%s457_s21] sm:$0xff]  ;;  %s1115_s24 = sadd.s32 %s903_s23, %s902_s22  ;;  %s477_s13 = scalar_lea.vmem %s1192_s7, %s912_s12 }
  0x16   : > { %497 = vperm.xlu0 %971, %v488_v2   ;;  %v494_v5 = vld [vmem:[%s477_s13] sm:$0xff]  ;;  %s473_s15 = scalar_lea.vmem %s1191_s6, %s1207_s28  ;;  %s906_s12 = sshll.u32 %s1106_s17, 2 }
  0x17   : > { %v1124_v6 = vld [vmem:[%s473_s15] sm:$0x1]  ;;  %s919_s16 = sshll.u32 %s1207_s28, 4  ;;  %s904_s18 = sshll.u32 %s1115_s24, 3 }
  0x18   : > { %970 = vset.pattern.permute.xlu1 %v1022_v3  ;;  %v688_v7 = vsel %vm687_vm0, %v1124_v6, 0.0  ;;  %s449_s21 = scalar_lea.vmem %s1186_s1, %s906_s12  ;;  %s1136_s26 = scalar_lea.vmem %s1188_s3, %s919_s16 }
  0x19   : > { %534 = vperm.xlu1 %970, %v492_v1   ;;  %s466_s14 = scalar_lea.vmem %s1189_s4, %s903_s23  ;;  %s1148_s2 = scalar_lea.vmem %s1185_s0, %s904_s18  ;;  %v487_v12 = vld [vmem:[%s449_s21] sm:$0x7]  ;;  %v916_v8 = vld [vmem:[%s1136_s26 + $0x8] ss:$0 sm:$0xff] }
  0x1a   : > { %972 = vset.pattern.permute.xlu0 %v1022_v3  ;;  %v489_v15 = vld [vmem:[%s1136_s26] sm:$0xff]  ;;  %v503_v20 = vrot.slane %v487_v12, %v1138_v10  ;;  %v512_v28 = vrot.slane %v487_v12, %v511_v11  ;;  %v521_v43 = vrot.slane %v487_v12, %v1150_v13  ;;  %v915_v60 = vld [vmem:[%s1148_s2 + $0x8] ss:$0 sm:$0xff]  ;;  %s484_s20 = scalar_lea.vmem %s1193_s8, %s1106_s17 }
  0x1b   : > { %506 = vperm.xlu0 %972, %v488_v2   ;;  %v491_v16 = vld [vmem:[%s466_s14] sm:$0x7]  ;;  %v571_v22 = vrot.slane %v489_v15, %v1138_v10  ;;  %v608_v23 = vrot.slane %v489_v15, %v511_v11  ;;  %v645_v27 = vrot.slane %v489_v15, %v1150_v13  ;;  %v576_v33 = vrot.slane %v489_v15, %v558_v17 }
  0x1c   : > { %v485_v18 = vld [vmem:[%s1148_s2] sm:$0xff]  ;;  %v540_v21 = vrot.slane %v491_v16, %v511_v11  ;;  %v531_v26 = vrot.slane %v491_v16, %v1138_v10  ;;  %v613_v39 = vrot.slane %v489_v15, %v595_v24  ;;  %v650_v45 = vrot.slane %v489_v15, %v632_v25 }
  0x1d   : > { %973 = vset.pattern.permute.xlu1 %v1023_v4  ;;  %v554_v30 = vrot.slane %v485_v18, %v1138_v10  ;;  %v591_v31 = vrot.slane %v485_v18, %v511_v11  ;;  %v628_v36 = vrot.slane %v485_v18, %v1150_v13  ;;  %v559_v38 = vrot.slane %v485_v18, %v558_v17 }
  0x1e   : > { %515 = vperm.xlu1 %973, %v488_v2   ;;  %v596_v41 = vrot.slane %v485_v18, %v595_v24  ;;  %v633_v42 = vrot.slane %v485_v18, %v632_v25  ;;  %v565_v47 = vrot.slane %v485_v18, %v564_v29  ;;  %v602_v48 = vrot.slane %v485_v18, %v601_v34 }
  0x1f   : > { %974 = vset.pattern.permute.xlu0 %v1023_v4  ;;  %v582_v49 = vrot.slane %v489_v15, %v564_v29  ;;  %v619_v50 = vrot.slane %v489_v15, %v601_v34  ;;  %v549_v51 = vrot.slane %v491_v16, %v1150_v13 }
  0x20   : > { %543 = vperm.xlu0 %974, %v492_v1  }
  0x22   : > { %975 = vset.pattern.permute.xlu1 %v1021_v0 }
  0x23   : > { %676 = vperm.xlu1 %975, %v494_v5  }
  0x24   : > { %976 = vset.pattern.permute.xlu0 %v1021_v0 }
  0x47   : > { %689 = vadd.xlane.f32.xlu1 %v688_v7 }
  0x93   : > { %v526_v14 = vpop.permute.xlu1 %525 }
  0x94   : > { %v532_v44 = vsub.f32 %v526_v14, %v531_v26 }
  0x95   : > { %v498_v19 = vpop.permute.xlu0 %497 }
  0x96   : > { %v504_v35 = vsub.f32 %v498_v19, %v503_v20  ;;  %v572_v62 = vmul.f32 %v571_v22, %v532_v44  ;;  %v609_v63 = vmul.f32 %v608_v23, %v532_v44  ;;  %v646_v9 = vmul.f32 %v645_v27, %v532_v44 }
  0x98   : > { %v535_v32 = vpop.permute.xlu1 %534  ;;  %v555_v52 = vmul.f32 %v554_v30, %v504_v35  ;;  %v592_v53 = vmul.f32 %v591_v31, %v504_v35  ;;  %v629_v0 = vmul.f32 %v628_v36, %v504_v35 }
  0x99   : > { %v541_v37 = vsub.f32 %v535_v32, %v540_v21 }
  0x9a   : > { %v507_v40 = vpop.permute.xlu0 %506 }
  0x9b   : > { %v513_v46 = vsub.f32 %v507_v40, %v512_v28  ;;  %v577_v54 = vmul.f32 %v576_v33, %v541_v37  ;;  %v614_v57 = vmul.f32 %v613_v39, %v541_v37  ;;  %v651_v1 = vmul.f32 %v650_v45, %v541_v37 }
  0x9d   : > { %v560_v55 = vmul.f32 %v559_v38, %v513_v46  ;;  %v516_v56 = vpop.permute.xlu1 %515  ;;  %v597_v58 = vmul.f32 %v596_v41, %v513_v46  ;;  %v634_v59 = vmul.f32 %v633_v42, %v513_v46  ;;  %v578_v14 = vadd.f32 %v577_v54, %v572_v62 }
  0x9e   : > { %v522_v61 = vsub.f32 %v516_v56, %v521_v43  ;;  %v615_v15 = vadd.f32 %v614_v57, %v609_v63  ;;  %v652_v16 = vadd.f32 %v651_v1, %v646_v9  ;;  %v684_v43 = vrot.slane %v1124_v6, %v1138_v10 }
  0x9f   : > { %v544_v2 = vpop.permute.xlu0 %543  ;;  %v561_v3 = vadd.f32 %v560_v55, %v555_v52  ;;  %v598_v4 = vadd.f32 %v597_v58, %v592_v53  ;;  %v635_v11 = vadd.f32 %v634_v59, %v629_v0 }
  0xa0   : > { %v566_v5 = vmul.f32 %v565_v47, %v522_v61  ;;  %v603_v7 = vmul.f32 %v602_v48, %v522_v61  ;;  %v640_v12 = vmul.f32 %v915_v60, %v522_v61  ;;  %v550_v13 = vsub.f32 %v544_v2, %v549_v51 }
  0xa2   : > { %v583_v17 = vmul.f32 %v582_v49, %v550_v13  ;;  %v620_v18 = vmul.f32 %v619_v50, %v550_v13  ;;  %v657_v19 = vmul.f32 %v916_v8, %v550_v13  ;;  %v567_v20 = vadd.f32 %v566_v5, %v561_v3  ;;  %v677_v42 = vpop.permute.xlu1 %676 }
  0xa3   : > { %v604_v21 = vadd.f32 %v603_v7, %v598_v4  ;;  %v641_v22 = vadd.f32 %v640_v12, %v635_v11 }
  0xa4   : > { %v584_v23 = vadd.f32 %v583_v17, %v578_v14  ;;  %v621_v24 = vadd.f32 %v620_v18, %v615_v15  ;;  %v658_v25 = vadd.f32 %v657_v19, %v652_v16 }
  0xa6   : > { %v585_v26 = vsub.f32 %v567_v20, %v584_v23  ;;  %v622_v28 = vsub.f32 %v604_v21, %v621_v24  ;;  %v659_v29 = vsub.f32 %v641_v22, %v658_v25 }
  0xa8   : > { %v586_v30 = vmul.f32 %v585_v26, %v585_v26  ;;  %v623_v27 = vmul.f32 %v622_v28, %v622_v28  ;;  %v660_v32 = vmul.f32 %v659_v29, %v659_v29 }
  0xaa   : > { %v624_v31 = vadd.f32 %v623_v27, %v586_v30 }
  0xac   : > { %v661_v33 = vadd.f32 %v660_v32, %v624_v31 }
  0xae   : > { %v662_v34 = vadd.f32 0.0001, %v661_v33 }
  0xb0   : > { %977 = vrsqrt.f32 %v662_v34  ;;  %vm665_vm1 = vcmp.eq.f32.partialorder %v662_v34, inf  ;;  %v668_v37 = vand.u32 2147483648, %v662_v34  ;;  %vm667_vm2 = vcmp.eq.f32.partialorder %v662_v34, 0.0 }
  0xba   : > { %v978_v35 = vpop.eup %977 }
  0xbb   : > { %v664_v36 = vmul.f32 %v978_v35, %v662_v34 }
  0xbd   : > { %v666_v38 = vsel %vm665_vm1, %v662_v34, %v664_v36 }
  0xbe   : > { %v669_v39 = vsel %vm667_vm2, %v668_v37, %v666_v38 }
  0xbf   : > { %v670_v40 = vmax.f32 %v669_v39, 0.0 }
  0xc1   : > { %v671_v41 = vmin.f32 %v670_v40, 10.0 }
  0xc3   : > { %v673_v44 = vmul.f32 0.1, %v671_v41 }
  0xc5   : > { %v679_v45 = vmul.f32 %v677_v42, %v673_v44 }
  0xc7   : > { %v686_v46 = vmul.f32 %v684_v43, %v679_v45 }
  0xc9   : > { %v699_v47 = vsel %vm698_vm3, %v686_v46, 0.0 }
  0xca   : > { %700 = vadd.xlane.f32.xlu0 %v699_v47 }
  0xd4   : > { %v690_v48 = vpop.xlane.xlu1 %689 }
  0xd5   : > { %v691_v49 = vrot.slane %v690_v48, 4 }
  0xd7   : > { %v692_v50 = vadd.f32 %v691_v49, %v690_v48 }
  0xd9   : > { %v693_v51 = vrot.slane %v692_v50, 2 }
  0xdb   : > { %v694_v52 = vadd.f32 %v693_v51, %v692_v50 }
  0xdd   : > { %v695_v53 = vrot.slane %v694_v52, 1 }
  0xdf   : > { %v696_v54 = vadd.f32 %v695_v53, %v694_v52 }
  0xe1   : > { %920 = vpush %v696_v54 }
 0x112   : > { %s921_s2 = spop %920 }
 0x113   : > { %s709_s28 = sadd.f32 0.0001, %s921_s2 }
 0x115   : > { %v710_v55 = vstv %s709_s28 }
 0x116   : > { %979 = vrcp.f32 %v710_v55 }
 0x120   : > { %v980_v61 = vpop.eup %979 }
 0x157   : > { %v701_v56 = vpop.xlane.xlu0 %700 }
 0x158   : > { %v702_v6 = vrot.slane %v701_v56, 4 }
 0x15a   : > { %v703_v10 = vadd.f32 %v702_v6, %v701_v56 }
 0x15c   : > { %v704_v57 = vrot.slane %v703_v10, 2 }
 0x15e   : > { %v705_v58 = vadd.f32 %v704_v57, %v703_v10 }
 0x160   : > { %v706_v59 = vrot.slane %v705_v58, 1 }
 0x162   : > { %v707_v60 = vadd.f32 %v706_v59, %v705_v58 }
 0x164   : > { %922 = vpush %v707_v60 }
 0x165   : > { %924 = vpush %v980_v61 }
 0x195   : > { %s923_s23 = spop %922 }
 0x196   : > { %s925_s12 = spop %924 }
 0x197   : > { %s713_s16 = smul.f32 %s925_s12, %s923_s23 }
 0x199   : > { %s717_s21 = smul.f32 %s925_s12, %s713_s16 }
 0x19b   : > { %v718_v62 = vstv %s717_s21 }
 0x19c   : > { %720 = vst.msk [vmem:[%s484_s20] sm:$0x1] %vm719_vm4, %v718_v62 }
 0x19d PF: > { %s18_s9 = sadd.s32 1, %s1019_s9   ;;  %s1196_s27 = smov %s1011_s29 }
 0x19e   : > { %p15_p7 = scmp.ge.s32.totalorder %s18_s9, 6   ;;  %s1197_s28 = smov %s1015_s30 }
 0x19f   : > { %s1198_s29 = smov %s1201_s10  ;;  %s1199_s30 = smov %s1205_s11 }
 0x1a0   :  { %17 = sbr.rel (!%p15_p7) target bundleno = 3 (0x3), region = 103 }

</bundles_post_ra>
